<compile_context>
chip_gen: v5e
topology: v5e:2x2
jax: 0.10.0
libtpu: 0.0.40
codegen_flags: <defaults>
</compile_context>

<pallas_src>
import functools

import jax
import jax.numpy as jnp
from jax.experimental import pallas as pl
from jax.experimental.pallas import tpu as pltpu


def _round_up(x: int, m: int) -> int:
    return ((x + m - 1) // m) * m


def dnn_kernel(x_ref, w1_ref, b1_ref, w2_ref, b2_ref, o_ref):
    # x_ref:  (TB, in_dim)  f32  (batch-tiled; ragged last tile masked on store)
    # w1_ref: (in_dim, E)   bf16 (VMEM-resident, constant index_map)
    # b1_ref: (1, E)        f32  (resident)
    # w2_ref: (E, C)        bf16 (resident)
    # b2_ref: (1, C)        f32  (resident)
    # o_ref:  (TB, C)       f32
    x = x_ref[...].astype(jnp.bfloat16)            # in-kernel cast (no wrapper pass)

    # Linear 1 (MXU, bf16 operands, f32 accumulate) + bias + ReLU in f32.
    h = jnp.dot(x, w1_ref[...], preferred_element_type=jnp.float32)
    h = jnp.maximum(h + b1_ref[...], 0.0)

    # Linear 2 (MXU) + bias.
    logits = jnp.dot(h.astype(jnp.bfloat16), w2_ref[...],
                     preferred_element_type=jnp.float32)
    logits = logits + b2_ref[...]

    # Numerically-stable log-softmax over the last dim. Row-local, so garbage
    # rows in a ragged last tile are harmless (their stores are dropped).
    m = jnp.max(logits, axis=-1, keepdims=True)
    shifted = logits - m
    lse = jnp.log(jnp.sum(jnp.exp(shifted), axis=-1, keepdims=True))
    o_ref[...] = (shifted - lse).astype(o_ref.dtype)


def prepare_params(w1, b1, w2, b2):
    """One-time packing, hoisted out of the per-call path."""
    w1_b = jnp.asarray(w1, jnp.bfloat16)
    b1_f = jnp.asarray(b1, jnp.float32).reshape(1, -1)
    w2_b = jnp.asarray(w2, jnp.bfloat16)
    b2_f = jnp.asarray(b2, jnp.float32).reshape(1, -1)
    return w1_b, b1_f, w2_b, b2_f


def _pick_batch_tile(B: int, block_b: int) -> int:
    """Large sublane-aligned (multiple-of-8) batch tile; prefer >=2 grid tiles
    so dimension_semantics=('parallel',) can use both v7x TensorCores."""
    tb = min(block_b, _round_up(B, 8))
    if B > 8:
        half = max(8, _round_up(-(-B // 2), 8))    # ceil(B/2) rounded up to 8
        tb = min(tb, half)
    return max(tb, 8)


@functools.partial(jax.jit, static_argnames=("block_b",))
def dnn_forward(x, w1_b, b1_f, w2_b, b2_f, *, block_b: int = 4096):
    B, in_dim = x.shape
    E = w1_b.shape[1]
    C = w2_b.shape[1]

    TB = _pick_batch_tile(B, block_b)
    grid = (pl.cdiv(B, TB),)                       # ragged last tile is masked

    # VMEM @ TB=4096 (lane-padded, double-buffered): x ~4 MiB, out ~4 MiB,
    # weights <10 KiB -> far below the 16/32 MiB default scoped limits.
    flops = 2 * B * (in_dim * E + E * C)
    transcendentals = B * (C + 1)                  # exp per logit + log per row
    bytes_accessed = (x.size * x.dtype.itemsize
                      + w1_b.size * 2 + w2_b.size * 2
                      + b1_f.size * 4 + b2_f.size * 4
                      + B * C * 4)

    return pl.pallas_call(
        dnn_kernel,
        out_shape=jax.ShapeDtypeStruct((B, C), jnp.float32),
        grid=grid,
        in_specs=[
            pl.BlockSpec((TB, in_dim), lambda i: (i, 0)),   # x: batch-tiled
            pl.BlockSpec((in_dim, E), lambda i: (0, 0)),    # W1: resident
            pl.BlockSpec((1, E), lambda i: (0, 0)),         # b1: resident
            pl.BlockSpec((E, C), lambda i: (0, 0)),         # W2: resident
            pl.BlockSpec((1, C), lambda i: (0, 0)),         # b2: resident
        ],
        out_specs=pl.BlockSpec((TB, C), lambda i: (i, 0)),
        compiler_params=pltpu.CompilerParams(
            dimension_semantics=("parallel",)),
        cost_estimate=pl.CostEstimate(
            flops=flops,
            transcendentals=transcendentals,
            bytes_accessed=bytes_accessed),
    )(x, w1_b, b1_f, w2_b, b2_f)


def init_params(key, in_dim=16, embbed_dim=32, num_classes=5):
    # Deterministic synthetic init (uniform, roughly matching torch's scale).
    k1, k2, k3, k4 = jax.random.split(key, 4)
    lim1 = 1.0 / (in_dim ** 0.5)
    lim2 = 1.0 / (embbed_dim ** 0.5)
    w1 = jax.random.uniform(k1, (in_dim, embbed_dim), jnp.float32, -lim1, lim1)
    b1 = jax.random.uniform(k2, (1, embbed_dim), jnp.float32, -lim1, lim1)
    w2 = jax.random.uniform(k3, (embbed_dim, num_classes), jnp.float32, -lim2, lim2)
    b2 = jax.random.uniform(k4, (1, num_classes), jnp.float32, -lim2, lim2)
    return w1, b1, w2, b2


def reference_forward_f32(x, w1, b1, w2, b2):
    h = jnp.maximum(x @ w1 + b1, 0.0)
    logits = h @ w2 + b2
    return jax.nn.log_softmax(logits, axis=-1)


def reference_forward_mixed(x, w1, b1, w2, b2):
    # Same mixed precision as the kernel: bf16 matmul operands, f32 accumulate,
    # f32 element-wise epilogue.
    h = jnp.dot(x.astype(jnp.bfloat16), w1.astype(jnp.bfloat16),
                preferred_element_type=jnp.float32) + b1
    h = jnp.maximum(h, 0.0)
    logits = jnp.dot(h.astype(jnp.bfloat16), w2.astype(jnp.bfloat16),
                     preferred_element_type=jnp.float32) + b2
    return jax.nn.log_softmax(logits, axis=-1)


if __name__ == "__main__":
    key = jax.random.PRNGKey(0)
    kx, kp = jax.random.split(key)

    in_dim, embbed_dim, num_classes = 16, 32, 5

    w1, b1, w2, b2 = init_params(kp, in_dim, embbed_dim, num_classes)
    params = jax.block_until_ready(prepare_params(w1, b1, w2, b2))  # one-time pack

    # Primary small test (batch = 8, single tile).
    batch = 8
    x = jax.random.normal(kx, (batch, in_dim), jnp.float32)
    out = jax.block_until_ready(dnn_forward(x, *params))
    assert out.shape == (batch, num_classes)

    ref_mixed = reference_forward_mixed(x, w1, b1, w2, b2)
    assert jnp.allclose(out, ref_mixed, atol=1e-4, rtol=1e-4), (
        jnp.max(jnp.abs(out - ref_mixed)))
    ref_f32 = reference_forward_f32(x, w1, b1, w2, b2)
    assert jnp.allclose(out, ref_f32, atol=5e-2, rtol=5e-2), (
        jnp.max(jnp.abs(out - ref_f32)))

    # Multi-tile + ragged-last-block test (batch = 13 -> two tiles of 8).
    x2 = jax.random.normal(jax.random.PRNGKey(1), (13, in_dim), jnp.float32)
    out2 = jax.block_until_ready(dnn_forward(x2, *params))
    assert out2.shape == (13, num_classes)
    ref2 = reference_forward_mixed(x2, w1, b1, w2, b2)
    assert jnp.allclose(out2, ref2, atol=1e-4, rtol=1e-4), (
        jnp.max(jnp.abs(out2 - ref2)))

    print("KERNEL_OK")
</pallas_src>

<mosaic_0001>
module attributes {stable_mosaic.version = 11 : i64} {
  func.func @dnn_kernel(%arg0: i32, %arg1: memref<8x16xf32, #tpu.memory_space<vmem>>, %arg2: memref<16x32xbf16, #tpu.memory_space<vmem>>, %arg3: memref<1x32xf32, #tpu.memory_space<vmem>>, %arg4: memref<32x5xbf16, #tpu.memory_space<vmem>>, %arg5: memref<1x5xf32, #tpu.memory_space<vmem>>, %arg6: memref<8x5xf32, #tpu.memory_space<vmem>>) attributes {dimension_semantics = [#tpu.dimension_semantics<parallel>], iteration_bounds = array<i64: 1>, scalar_prefetch = 0 : i64, scratch_operands = 0 : i64, tpu.core_type = #tpu.core_type<tc>, window_params = [{transform_indices = @transform_0, window_bounds = array<i64: 8, 16>}, {pipeline_mode = #tpu.pipeline_mode<synchronous>, transform_indices = @transform_1, window_bounds = array<i64: 16, 32>}, {pipeline_mode = #tpu.pipeline_mode<synchronous>, transform_indices = @transform_2, window_bounds = array<i64: 1, 32>}, {pipeline_mode = #tpu.pipeline_mode<synchronous>, transform_indices = @transform_3, window_bounds = array<i64: 32, 5>}, {pipeline_mode = #tpu.pipeline_mode<synchronous>, transform_indices = @transform_4, window_bounds = array<i64: 1, 5>}, {transform_indices = @transform_5, window_bounds = array<i64: 8, 5>}]} {
    %c0 = arith.constant 0 : index
    %c0_0 = arith.constant 0 : index
    %0 = vector.load %arg1[%c0, %c0_0] : memref<8x16xf32, #tpu.memory_space<vmem>>, vector<8x16xf32>
    %1 = arith.truncf %0 : vector<8x16xf32> to vector<8x16xbf16>
    %c0_1 = arith.constant 0 : index
    %c0_2 = arith.constant 0 : index
    %2 = vector.load %arg2[%c0_1, %c0_2] : memref<16x32xbf16, #tpu.memory_space<vmem>>, vector<16x32xbf16>
    %cst = arith.constant dense<0.000000e+00> : vector<8x32xf32>
    %3 = tpu.matmul %1, %2, %cst {dimension_numbers = #tpu.dot_dimension_numbers<[1], [0], [0], [1], [0, 0, 1, 1], [], []>} : vector<8x16xbf16>, vector<16x32xbf16>, vector<8x32xf32> -> vector<8x32xf32>
    %c0_3 = arith.constant 0 : index
    %c0_4 = arith.constant 0 : index
    %4 = vector.load %arg3[%c0_3, %c0_4] : memref<1x32xf32, #tpu.memory_space<vmem>>, vector<1x32xf32>
    %5 = vector.broadcast %4 : vector<1x32xf32> to vector<8x32xf32>
    %6 = arith.addf %3, %5 : vector<8x32xf32>
    %cst_5 = arith.constant 0.000000e+00 : f32
    %7 = vector.broadcast %cst_5 : f32 to vector<8x32xf32>
    %8 = arith.maximumf %6, %7 : vector<8x32xf32>
    %9 = arith.truncf %8 : vector<8x32xf32> to vector<8x32xbf16>
    %c0_6 = arith.constant 0 : index
    %c0_7 = arith.constant 0 : index
    %10 = vector.load %arg4[%c0_6, %c0_7] : memref<32x5xbf16, #tpu.memory_space<vmem>>, vector<32x5xbf16>
    %cst_8 = arith.constant dense<0.000000e+00> : vector<8x5xf32>
    %11 = tpu.matmul %9, %10, %cst_8 {dimension_numbers = #tpu.dot_dimension_numbers<[1], [0], [0], [1], [0, 0, 1, 1], [], []>} : vector<8x32xbf16>, vector<32x5xbf16>, vector<8x5xf32> -> vector<8x5xf32>
    %c0_9 = arith.constant 0 : index
    %c0_10 = arith.constant 0 : index
    %12 = vector.load %arg5[%c0_9, %c0_10] : memref<1x5xf32, #tpu.memory_space<vmem>>, vector<1x5xf32>
    %13 = vector.broadcast %12 : vector<1x5xf32> to vector<8x5xf32>
    %14 = arith.addf %11, %13 : vector<8x5xf32>
    %cst_11 = arith.constant dense<0xFF800000> : vector<8xf32>
    %15 = vector.multi_reduction <maximumf>, %14, %cst_11 [1] : vector<8x5xf32> to vector<8xf32>
    %16 = vector.shape_cast %15 : vector<8xf32> to vector<8x1xf32>
    %17 = vector.broadcast %16 : vector<8x1xf32> to vector<8x5xf32>
    %18 = arith.subf %14, %17 : vector<8x5xf32>
    %19 = math.exp %18 : vector<8x5xf32>
    %cst_12 = arith.constant dense<0.000000e+00> : vector<8xf32>
    %20 = vector.multi_reduction <add>, %19, %cst_12 [1] : vector<8x5xf32> to vector<8xf32>
    %21 = vector.shape_cast %20 : vector<8xf32> to vector<8x1xf32>
    %22 = math.log %21 : vector<8x1xf32>
    %23 = vector.broadcast %22 : vector<8x1xf32> to vector<8x5xf32>
    %24 = arith.subf %18, %23 : vector<8x5xf32>
    %c0_13 = arith.constant 0 : index
    %c0_14 = arith.constant 0 : index
    %25 = vector.load %arg6[%c0_13, %c0_14] : memref<8x5xf32, #tpu.memory_space<vmem>>, vector<8x5xf32>
    tpu.vector_store %arg6[%c0_13, %c0_14], %24 {strides = array<i32>} : memref<8x5xf32, #tpu.memory_space<vmem>>, vector<8x5xf32>,
    return
  }
  func.func @transform_0(%arg0: i32) -> (i32, i32) {
    %c0_i32 = arith.constant 0 : i32
    %c0_i32_0 = arith.constant 0 : i32
    return %arg0, %c0_i32 : i32, i32
  }
  func.func @transform_1(%arg0: i32) -> (i32, i32) {
    %c0_i32 = arith.constant 0 : i32
    %c0_i32_0 = arith.constant 0 : i32
    %c0_i32_1 = arith.constant 0 : i32
    return %c0_i32, %c0_i32_0 : i32, i32
  }
  func.func @transform_2(%arg0: i32) -> (i32, i32) {
    %c0_i32 = arith.constant 0 : i32
    %c0_i32_0 = arith.constant 0 : i32
    %c0_i32_1 = arith.constant 0 : i32
    return %c0_i32, %c0_i32_0 : i32, i32
  }
  func.func @transform_3(%arg0: i32) -> (i32, i32) {
    %c0_i32 = arith.constant 0 : i32
    %c0_i32_0 = arith.constant 0 : i32
    %c0_i32_1 = arith.constant 0 : i32
    return %c0_i32, %c0_i32_0 : i32, i32
  }
  func.func @transform_4(%arg0: i32) -> (i32, i32) {
    %c0_i32 = arith.constant 0 : i32
    %c0_i32_0 = arith.constant 0 : i32
    %c0_i32_1 = arith.constant 0 : i32
    return %c0_i32, %c0_i32_0 : i32, i32
  }
  func.func @transform_5(%arg0: i32) -> (i32, i32) {
    %c0_i32 = arith.constant 0 : i32
    %c0_i32_0 = arith.constant 0 : i32
    return %arg0, %c0_i32 : i32, i32
  }
}

</mosaic_0001>

<bundles_post_ra>
// kernel: dnn_forward.1
= control target key start
LH: loop header
LB: loop body
LE: loop exit
PB: predicated region body
PF: predicated region fallthrough
CT: control target
= control target key end

     0   :  { %s227_s0 = inlined_call_operand.vmem [shape: f32[8,16], index: 0, kind: input, shape index: {}]   ;;  %s228_s1 = inlined_call_operand.vmem [shape: bf16[16,32], index: 1, kind: input, shape index: {}]   ;;  %s229_s2 = inlined_call_operand.vmem [shape: f32[1,32], index: 2, kind: input, shape index: {}]   ;;  %s230_s3 = inlined_call_operand.vmem [shape: bf16[32,5], index: 3, kind: input, shape index: {}]   ;;  %s231_s4 = inlined_call_operand.vmem [shape: f32[1,5], index: 4, kind: input, shape index: {}]   ;;  %s232_s5 = inlined_call_operand.hbm [shape: f32[8,5], index: 5, kind: output, shape index: {}]  }
   0x1   :  { %v136_v0 = vld [vmem:[%s228_s1] sm:$0xff] }
   0x2   :  { %v22_v1 = vld [vmem:[%s227_s0] sm:$0xff] }
   0x3   :  { %v23_v2 = vpack.c.bf16 %v22_v1, %v22_v1 }
   0x4   :  { %10 = vsyncpa [#allocation3], 0  ;;  %47 = vmatpush.bf16.msra.mxu0 %v136_v0  ;;  %vm36_vm0 = vcmask 130048   ;;  %v138_v3 = vld [vmem:[%s230_s3 + $0x8] sm:$0xff]  ;;  %v137_v4 = vld [vmem:[%s230_s3] sm:$0xff]  ;;  %vm75_vm1 = vcmask 261120  }
   0x5   :  { %85 = vmatpush.bf16.msra.mxu1 %v138_v3  ;;  %v140_v5 = vld [vmem:[%s229_s2] ss:$0 sm:$0xff]  ;;  %vm92_vm2 = vcmask 39936   ;;  %s172_s2 = smov [#allocation2]   ;;  %s113_s29 = sshll.u32 %s232_s5, 4  ;;  %s114_s29 = int_to_ptr.hbm [resolvable:$true] %s113_s29 }
   0x6   :  { %v141_v11 = vld [vmem:[%s231_s4] ss:$0 sm:$0xff]  ;;  %s111_s3 = sshll.u32 %s172_s2, 4  ;;  %s112_s3 = int_to_ptr.vmem [resolvable:$true] %s111_s3 }
   0x7   :  { %126 = vmatmul.msk.bf16.vlgmr.msra.gmra.mxu0 %vm36_vm0, %v23_v2 }
   0x9   :  { %86 = vmatpush.bf16.msra.mxu1 %v137_v4 }
  0x84   :  { %v49_v6 = vpop.f32.mrf.mxu0 }
  0x85   :  { %v50_v7 = vadd.f32 %v140_v5, %v49_v6 }
  0x87   :  { %v53_v8 = vmax.f32 %v50_v7, 0.0 }
  0x89   :  { %v54_v9 = vpack.c.bf16 %v53_v8, %v53_v8 }
  0x8b   :  { %135 = vmatmul.msk.bf16.vlgmr.msra.gmra.mxu1 %vm75_vm1, %v54_v9 }
  0x8c   :  { %v51_v10 = vpop.f32.mrf.mxu0 }
 0x108   :  { %v88_v12 = vpop.f32.mrf.mxu1 }
 0x109   :  { %v89_v13 = vadd.f32 %v141_v11, %v88_v12 }
 0x10b   :  { %v93_v14 = vsel %vm92_vm2, %v89_v13, -inf }
 0x10c   :  { %94 = vmax.xlane.f32.xlu0 %v93_v14 }
 0x110   :  { %v90_v15 = vpop.f32.mrf.mxu1 }
 0x17f   :  { %v95_v16 = vpop.xlane.xlu0 %94 }
 0x180   :  { %v96_v17 = vsub.f32 %v89_v13, %v95_v16 }
 0x182   :  { %v97_v18 = vmul.f32 1.442695, %v96_v17 }
 0x184   :  { %142 = vpow2.f32 %v97_v18 }
 0x18a   :  { %v143_v19 = vpop.eup %142 }
 0x18b   :  { %v99_v20 = vsel %vm92_vm2, %v143_v19, 0.0 }
 0x18c   :  { %100 = vadd.xlane.f32.xlu0 %v99_v20 }
 0x1ff   :  { %v101_v21 = vpop.xlane.xlu0 %100 }
 0x200   :  { %144 = vlog2.f32 %v101_v21 }
 0x206   :  { %v145_v22 = vpop.eup %144 }
 0x207   :  { %v103_v23 = vmul.f32 0.6931472, %v145_v22 }
 0x209   :  { %v104_v24 = vsub.f32 %v96_v17, %v103_v23 }
 0x20b   :  { %105 = vst.msk [vmem:[#allocation2] sm:$0xff] %vm92_vm2, %v104_v24 }
 0x20c   :  { %116 = dma.vmem_to_hbm [thread:$0]  %s112_s3, 128, %s114_s29, [#allocation3]  }
 0x20d   :  { %170 = dma.done.wait [#allocation3], 128  }
 0x20e   :  { %171 = vsyncadd [#allocation3], 4294967168 }
 0x20f   :  { %121 = vsyncpa [#allocation3], 1 }

</bundles_post_ra>
